<compile_context>
chip_gen: v5e
topology: v5e:2x2
jax: 0.10.0
libtpu: 0.0.40
codegen_flags: <defaults>
</compile_context>

<pallas_src>
import functools

import jax
import jax.numpy as jnp
from jax.experimental import pallas as pl
from jax.experimental.pallas import tpu as pltpu


def _round_up(x, m):
    return (x + m - 1) // m * m


def _vmem_capacity_bytes(default=64 * 1024 * 1024):
    try:
        info = pltpu.get_tpu_info()
        return int(getattr(info, "vmem_capacity_bytes", default))
    except Exception:
        return default


def _convblock_kernel(w_ref, x_ref, prm_ref, o_ref, s1_ref, s2_ref, *,
                      eps, l_valid, count, batch, k, stride, dilation, tl, ext):
    # w_ref:   (TCO, CK)            conv weight tile, CK = K*C_in_pad, tap-major
    # x_ref:   (N, C_in_pad, L_x)   padded input, resident in VMEM (fetched once)
    # prm_ref: (TCO, 8) f32         col0=gamma, col1=beta
    # o_ref:   (N, TCO, L_pad)      output slab, resident across the L-tile axis
    # s1/s2:   (TCO, 1) f32         per-channel sum / sum-of-squares scratch
    j = pl.program_id(1)
    num_l = pl.num_programs(1)

    @pl.when(j == 0)
    def _init():
        s1_ref[...] = jnp.zeros(s1_ref.shape, jnp.float32)
        s2_ref[...] = jnp.zeros(s2_ref.shape, jnp.float32)

    col0 = pl.multiple_of(j * tl, 128)
    w = w_ref[...]                                            # (TCO, CK)

    # ---- build the (CK, N*TL) patch operand from K shifted views of x ----
    if stride == 1:
        # One aligned window load covers every tap of this L tile.
        win = x_ref[:, :, pl.ds(col0, tl + ext)]              # (N, C_in_pad, TL+EXT)
        taps = []
        for t in range(k):
            off = t * dilation                                # static value slice
            rows = [win[nn, :, off:off + tl] for nn in range(batch)]
            taps.append(rows[0] if batch == 1 else jnp.concatenate(rows, axis=1))
    else:
        # TODO(synk): strided ref loads (stride > 1) are untested on this path.
        taps = []
        for t in range(k):
            start = col0 * stride + t * dilation
            sl = x_ref[:, :, pl.ds(start, tl, stride=stride)]  # (N, C_in_pad, TL)
            rows = [sl[nn] for nn in range(batch)]
            taps.append(rows[0] if batch == 1 else jnp.concatenate(rows, axis=1))
    p = taps[0] if k == 1 else jnp.concatenate(taps, axis=0)   # (CK, N*TL)

    # ---- one MXU matmul for the whole batch of this L tile ----
    y = jnp.dot(w, p, preferred_element_type=jnp.float32)      # (TCO, N*TL) f32

    # ---- BN batch statistics (mask padded output columns; see NOTE above) ----
    lane = jax.lax.broadcasted_iota(jnp.int32, (1, tl), 1)
    maskf = ((col0 + lane) < l_valid).astype(jnp.float32)      # (1, TL)
    if batch > 1:
        maskf = jnp.concatenate([maskf] * batch, axis=1)       # (1, N*TL)
    ym = y * maskf
    s1_ref[...] += jnp.sum(ym, axis=1, keepdims=True)
    s2_ref[...] += jnp.sum(ym * ym, axis=1, keepdims=True)

    # ---- stash the raw conv tiles into the VMEM-resident output slab ----
    for nn in range(batch):
        o_ref[nn, :, pl.ds(col0, tl)] = y[:, nn * tl:(nn + 1) * tl].astype(o_ref.dtype)

    @pl.when(j == num_l - 1)
    def _finalize():
        gamma = prm_ref[:, 0:1]
        beta = prm_ref[:, 1:2]
        inv_cnt = 1.0 / count
        mean_c = s1_ref[...] * inv_cnt                         # mean of bias-free conv
        var = jnp.maximum(s2_ref[...] * inv_cnt - mean_c * mean_c, 0.0)
        # Conv bias shifts the batch mean by exactly the bias, so it cancels in
        # train-mode BN: out = conv*scale + (beta - mean_c*scale).
        scale = gamma * jax.lax.rsqrt(var + eps)               # (TCO, 1) f32, hoisted
        shift = beta - mean_c * scale                          # (TCO, 1) f32, hoisted
        for nn in range(batch):                                # bounded live ranges
            yl = o_ref[nn].astype(jnp.float32)                 # (TCO, L_pad)
            o_ref[nn] = jnp.maximum(yl * scale + shift, 0.0).astype(o_ref.dtype)


def conv_block_forward(x, weight, bias, gamma, beta, *, stride=1, dilation=1,
                       eps=1e-5, compute_dtype=jnp.bfloat16,
                       out_dtype=jnp.bfloat16):
    """x: (N, C_in, L); weight: (C_out, C_in, K); bias/gamma/beta: (C_out,).

    Returns (N, C_out, L_out) = ReLU(BatchNorm1d(Conv1dSamePadding(x))) with
    training-mode (batch) statistics.  `bias` is accepted for API fidelity but
    cancels exactly under train-mode BN, so it never enters the kernel.
    """
    del bias  # cancels under train-mode BatchNorm (see note above)
    n, c_in, l_in = x.shape
    c_out, _, k = weight.shape

    # --- TF-style "same" padding (replica of conv1d_same_padding) ---
    padding = max((l_in - 1) * stride - l_in + dilation * (k - 1) + 1, 0)
    odd = padding % 2
    p2 = padding // 2
    l_conv_in = l_in + odd + 2 * p2
    l_out = (l_conv_in - dilation * (k - 1) - 1) // stride + 1

    # --- generation-aware tile / VMEM budget ---
    vmem_cap = _vmem_capacity_bytes()
    vmem_limit = min(vmem_cap * 3 // 4, 100 * 1024 * 1024)     # 48 MiB v7x, 96 MiB v5e/v6e
    l_tile_cap = 2048 if vmem_cap > 64 * 1024 * 1024 else 1024

    tl = min(_round_up(l_out, 128), l_tile_cap)                # lane tile, multiple of 128
    l_pad = _round_up(l_out, tl)
    num_l = l_pad // tl

    out_bytes = jnp.dtype(out_dtype).itemsize
    slab_cap = vmem_limit // 6         # leaves room for 2x out buffers + resident x + temps
    tco = 8
    for cand in (128, 64, 32, 16, 8):
        if cand <= _round_up(c_out, 8) and n * cand * l_pad * out_bytes <= slab_cap:
            tco = cand
            break
    # v7x megacore: keep >= 2 blocks on the "parallel" channel axis when c_out allows.
    while tco > 8 and _round_up(c_out, tco) // tco < 2:
        tco //= 2
    co_pad = _round_up(c_out, tco)

    c_in_pad = _round_up(c_in, 8)
    ck = k * c_in_pad

    # --- how much padded x the kernel may read ---
    if stride == 1:
        ext = _round_up((k - 1) * dilation, 128) if k > 1 else 0
        l_x_need = l_pad + ext
    else:
        ext = 0
        l_x_need = (l_pad - 1) * stride + (k - 1) * dilation + 1
    l_x_pad = _round_up(max(l_x_need, l_conv_in), 128)

    # Single combined pad ("same" padding + channel/length alignment) + single cast.
    x_p = jnp.pad(x.astype(compute_dtype),
                  ((0, 0), (0, c_in_pad - c_in), (p2, l_x_pad - l_in - p2)))

    # Weight in tap-major (t, ci) layout to match the in-kernel tap concat.
    w_t = jnp.transpose(weight.astype(jnp.float32), (0, 2, 1))          # (C_out, K, C_in)
    w_t = jnp.pad(w_t, ((0, co_pad - c_out), (0, 0), (0, c_in_pad - c_in)))
    w2 = w_t.reshape(co_pad, ck).astype(compute_dtype)

    params = jnp.zeros((co_pad, 8), jnp.float32)
    params = params.at[:c_out, 0].set(gamma.astype(jnp.float32))
    params = params.at[:c_out, 1].set(beta.astype(jnp.float32))

    grid = (co_pad // tco, num_l)
    kernel = functools.partial(
        _convblock_kernel, eps=float(eps), l_valid=int(l_out),
        count=float(n * l_out), batch=int(n), k=int(k), stride=int(stride),
        dilation=int(dilation), tl=int(tl), ext=int(ext))

    out = pl.pallas_call(
        kernel,
        out_shape=jax.ShapeDtypeStruct((n, co_pad, l_pad), out_dtype),
        grid_spec=pltpu.PrefetchScalarGridSpec(
            num_scalar_prefetch=0,
            grid=grid,
            in_specs=[
                pl.BlockSpec((tco, ck), lambda i, j: (i, 0)),                 # weight
                pl.BlockSpec((n, c_in_pad, l_x_pad), lambda i, j: (0, 0, 0)),  # x (resident)
                pl.BlockSpec((tco, 8), lambda i, j: (i, 0)),                  # gamma/beta
            ],
            out_specs=pl.BlockSpec((n, tco, l_pad), lambda i, j: (0, i, 0)),
            scratch_shapes=[pltpu.VMEM((tco, 1), jnp.float32),
                            pltpu.VMEM((tco, 1), jnp.float32)],
        ),
        compiler_params=pltpu.CompilerParams(
            dimension_semantics=("parallel", "arbitrary"),
            vmem_limit_bytes=int(vmem_limit)),
    )(w2, x_p, params)

    if co_pad == c_out and l_pad == l_out:
        return out
    return out[:, :c_out, :l_out]


def _reference(x, weight, bias, gamma, beta, *, stride=1, dilation=1, eps=1e-5):
    """Pure-JAX f32 reference replicating the PyTorch ConvBlock forward."""
    n, c_in, l_in = x.shape
    c_out, _, k = weight.shape
    padding = max((l_in - 1) * stride - l_in + dilation * (k - 1) + 1, 0)
    if padding % 2 != 0:
        x = jnp.pad(x, ((0, 0), (0, 0), (0, 1)))
    p2 = padding // 2
    y = jax.lax.conv_general_dilated(
        x, weight, window_strides=(stride,), padding=[(p2, p2)],
        rhs_dilation=(dilation,), dimension_numbers=("NCH", "OIH", "NCH"))
    y = y + bias[None, :, None]
    mean = jnp.mean(y, axis=(0, 2), keepdims=True)
    var = jnp.mean((y - mean) ** 2, axis=(0, 2), keepdims=True)
    y = (y - mean) * jax.lax.rsqrt(var + eps)
    y = y * gamma[None, :, None] + beta[None, :, None]
    return jnp.maximum(y, 0.0)


if __name__ == "__main__":
    # Small shapes consistent with the module: batch=2, in_channels=4, length=16.
    N, C_IN, L = 2, 4, 16
    C_OUT, K, STRIDE = 8, 3, 1

    key = jax.random.PRNGKey(0)
    kx, kw, kb, kg, kbe = jax.random.split(key, 5)

    x = jax.random.normal(kx, (N, C_IN, L), dtype=jnp.float32)

    # Deterministic parameter init (PyTorch Conv1d-style uniform bound).
    fan_in = C_IN * K
    bound = 1.0 / (fan_in ** 0.5)
    weight = jax.random.uniform(kw, (C_OUT, C_IN, K), jnp.float32, -bound, bound)
    bias = jax.random.uniform(kb, (C_OUT,), jnp.float32, -bound, bound)
    gamma = jax.random.uniform(kg, (C_OUT,), jnp.float32, 0.5, 1.5)   # BN weight
    beta = 0.1 * jax.random.normal(kbe, (C_OUT,), dtype=jnp.float32)  # BN bias

    ref = _reference(x, weight, bias, gamma, beta, stride=STRIDE)

    # Default perf path: bf16 MXU operands, f32 stats, bf16 slab/output.
    out_bf16 = conv_block_forward(x, weight, bias, gamma, beta, stride=STRIDE)
    out_bf16 = jax.block_until_ready(out_bf16)
    assert out_bf16.shape == (N, C_OUT, L), out_bf16.shape
    assert jnp.allclose(out_bf16.astype(jnp.float32), ref, atol=5e-2, rtol=5e-2), \
        float(jnp.max(jnp.abs(out_bf16.astype(jnp.float32) - ref)))

    # Full-precision path: f32 compute, f32 slab/output (same kernel).
    out_f32 = conv_block_forward(x, weight, bias, gamma, beta, stride=STRIDE,
                                 compute_dtype=jnp.float32, out_dtype=jnp.float32)
    out_f32 = jax.block_until_ready(out_f32)
    assert out_f32.shape == (N, C_OUT, L), out_f32.shape
    assert jnp.allclose(out_f32, ref, atol=5e-2, rtol=5e-2), \
        float(jnp.max(jnp.abs(out_f32 - ref)))

    print("KERNEL_OK")
</pallas_src>

<mosaic_0001>
module attributes {stable_mosaic.version = 11 : i64} {
  func.func @_convblock_kernel(%arg0: i32, %arg1: i32, %arg2: memref<8x24xbf16, #tpu.memory_space<vmem>>, %arg3: memref<2x8x256xbf16, #tpu.memory_space<vmem>>, %arg4: memref<8x8xf32, #tpu.memory_space<vmem>>, %arg5: memref<2x8x128xbf16, #tpu.memory_space<vmem>>, %arg6: memref<8x1xf32, #tpu.memory_space<vmem>>, %arg7: memref<8x1xf32, #tpu.memory_space<vmem>>) attributes {dimension_semantics = [#tpu.dimension_semantics<parallel>, #tpu.dimension_semantics<arbitrary>], iteration_bounds = array<i64: 1, 1>, scalar_prefetch = 0 : i64, scratch_operands = 2 : i64, tpu.core_type = #tpu.core_type<tc>, window_params = [{transform_indices = @transform_0, window_bounds = array<i64: 8, 24>}, {pipeline_mode = #tpu.pipeline_mode<synchronous>, transform_indices = @transform_1, window_bounds = array<i64: 2, 8, 256>}, {transform_indices = @transform_2, window_bounds = array<i64: 8, 8>}, {transform_indices = @transform_3, window_bounds = array<i64: 2, 8, 128>}]} {
    %c0_i32 = arith.constant 0 : i32
    %0 = arith.cmpi eq, %arg1, %c0_i32 : i32
    %1 = arith.extui %0 : i1 to i32
    %c0_i32_0 = arith.constant 0 : i32
    %2 = arith.cmpi ne, %1, %c0_i32_0 : i32
    scf.if %2 {
      %cst_19 = arith.constant 0.000000e+00 : f32
      %61 = vector.broadcast %cst_19 : f32 to vector<8x1xf32>
      %c0_20 = arith.constant 0 : index
      %c0_21 = arith.constant 0 : index
      %62 = vector.load %arg6[%c0_20, %c0_21] : memref<8x1xf32, #tpu.memory_space<vmem>>, vector<8x1xf32>
      tpu.vector_store %arg6[%c0_20, %c0_21], %61 {strides = array<i32>} : memref<8x1xf32, #tpu.memory_space<vmem>>, vector<8x1xf32>,
      %cst_22 = arith.constant 0.000000e+00 : f32
      %63 = vector.broadcast %cst_22 : f32 to vector<8x1xf32>
      %c0_23 = arith.constant 0 : index
      %c0_24 = arith.constant 0 : index
      %64 = vector.load %arg7[%c0_23, %c0_24] : memref<8x1xf32, #tpu.memory_space<vmem>>, vector<8x1xf32>
      tpu.vector_store %arg7[%c0_23, %c0_24], %63 {strides = array<i32>} : memref<8x1xf32, #tpu.memory_space<vmem>>, vector<8x1xf32>,
    } else {
    }
    %c128_i32 = arith.constant 128 : i32
    %3 = arith.muli %arg1, %c128_i32 : i32
    %4 = tpu.assume_multiple %3, 128 : i32
    %c0 = arith.constant 0 : index
    %c0_1 = arith.constant 0 : index
    %5 = vector.load %arg2[%c0, %c0_1] : memref<8x24xbf16, #tpu.memory_space<vmem>>, vector<8x24xbf16>
    %c0_2 = arith.constant 0 : index
    %c0_3 = arith.constant 0 : index
    %6 = arith.index_cast %4 : i32 to index
    %7 = vector.load %arg3[%c0_2, %c0_3, %6] : memref<2x8x256xbf16, #tpu.memory_space<vmem>>, vector<2x8x256xbf16>
    %8 = vector.extract_strided_slice %7 {offsets = [0, 0, 0], sizes = [1, 8, 128], strides = [1, 1, 1]} : vector<2x8x256xbf16> to vector<1x8x128xbf16>
    %9 = vector.shape_cast %8 : vector<1x8x128xbf16> to vector<8x128xbf16>
    %10 = vector.extract_strided_slice %7 {offsets = [1, 0, 0], sizes = [1, 8, 128], strides = [1, 1, 1]} : vector<2x8x256xbf16> to vector<1x8x128xbf16>
    %11 = vector.shape_cast %10 : vector<1x8x128xbf16> to vector<8x128xbf16>
    %12 = tpu.concatenate %9, %11 in 1 : vector<8x128xbf16>, vector<8x128xbf16> -> vector<8x256xbf16>
    %13 = vector.extract_strided_slice %7 {offsets = [0, 0, 1], sizes = [1, 8, 128], strides = [1, 1, 1]} : vector<2x8x256xbf16> to vector<1x8x128xbf16>
    %14 = vector.shape_cast %13 : vector<1x8x128xbf16> to vector<8x128xbf16>
    %15 = vector.extract_strided_slice %7 {offsets = [1, 0, 1], sizes = [1, 8, 128], strides = [1, 1, 1]} : vector<2x8x256xbf16> to vector<1x8x128xbf16>
    %16 = vector.shape_cast %15 : vector<1x8x128xbf16> to vector<8x128xbf16>
    %17 = tpu.concatenate %14, %16 in 1 : vector<8x128xbf16>, vector<8x128xbf16> -> vector<8x256xbf16>
    %18 = vector.extract_strided_slice %7 {offsets = [0, 0, 2], sizes = [1, 8, 128], strides = [1, 1, 1]} : vector<2x8x256xbf16> to vector<1x8x128xbf16>
    %19 = vector.shape_cast %18 : vector<1x8x128xbf16> to vector<8x128xbf16>
    %20 = vector.extract_strided_slice %7 {offsets = [1, 0, 2], sizes = [1, 8, 128], strides = [1, 1, 1]} : vector<2x8x256xbf16> to vector<1x8x128xbf16>
    %21 = vector.shape_cast %20 : vector<1x8x128xbf16> to vector<8x128xbf16>
    %22 = tpu.concatenate %19, %21 in 1 : vector<8x128xbf16>, vector<8x128xbf16> -> vector<8x256xbf16>
    %23 = tpu.concatenate %12, %17, %22 in 0 : vector<8x256xbf16>, vector<8x256xbf16>, vector<8x256xbf16> -> vector<24x256xbf16>
    %cst = arith.constant dense<0.000000e+00> : vector<8x256xf32>
    %24 = tpu.matmul %5, %23, %cst {dimension_numbers = #tpu.dot_dimension_numbers<[1], [0], [0], [1], [0, 0, 1, 1], [], []>} : vector<8x24xbf16>, vector<24x256xbf16>, vector<8x256xf32> -> vector<8x256xf32>
    %25 = tpu.iota {dimensions = array<i32: 1>} : vector<1x128xi32>
    %26 = vector.broadcast %4 : i32 to vector<1x128xi32>
    %27 = arith.addi %26, %25 : vector<1x128xi32>
    %c16_i32 = arith.constant 16 : i32
    %28 = vector.broadcast %c16_i32 : i32 to vector<1x128xi32>
    %29 = arith.cmpi slt, %27, %28 : vector<1x128xi32>
    %30 = arith.extui %29 : vector<1x128xi1> to vector<1x128xi32>
    %31 = arith.sitofp %30 : vector<1x128xi32> to vector<1x128xf32>
    %32 = tpu.concatenate %31, %31 in 1 : vector<1x128xf32>, vector<1x128xf32> -> vector<1x256xf32>
    %33 = vector.broadcast %32 : vector<1x256xf32> to vector<8x256xf32>
    %34 = arith.mulf %24, %33 : vector<8x256xf32>
    %c0_4 = arith.constant 0 : index
    %c0_5 = arith.constant 0 : index
    %35 = vector.load %arg6[%c0_4, %c0_5] : memref<8x1xf32, #tpu.memory_space<vmem>>, vector<8x1xf32>
    %cst_6 = arith.constant dense<0.000000e+00> : vector<8xf32>
    %36 = vector.multi_reduction <add>, %34, %cst_6 [1] : vector<8x256xf32> to vector<8xf32>
    %37 = vector.shape_cast %36 : vector<8xf32> to vector<8x1xf32>
    %38 = arith.addf %35, %37 : vector<8x1xf32>
    %c0_7 = arith.constant 0 : index
    %c0_8 = arith.constant 0 : index
    %39 = vector.load %arg6[%c0_7, %c0_8] : memref<8x1xf32, #tpu.memory_space<vmem>>, vector<8x1xf32>
    tpu.vector_store %arg6[%c0_7, %c0_8], %38 {strides = array<i32>} : memref<8x1xf32, #tpu.memory_space<vmem>>, vector<8x1xf32>,
    %c0_9 = arith.constant 0 : index
    %c0_10 = arith.constant 0 : index
    %40 = vector.load %arg7[%c0_9, %c0_10] : memref<8x1xf32, #tpu.memory_space<vmem>>, vector<8x1xf32>
    %41 = arith.mulf %34, %34 : vector<8x256xf32>
    %cst_11 = arith.constant dense<0.000000e+00> : vector<8xf32>
    %42 = vector.multi_reduction <add>, %41, %cst_11 [1] : vector<8x256xf32> to vector<8xf32>
    %43 = vector.shape_cast %42 : vector<8xf32> to vector<8x1xf32>
    %44 = arith.addf %40, %43 : vector<8x1xf32>
    %c0_12 = arith.constant 0 : index
    %c0_13 = arith.constant 0 : index
    %45 = vector.load %arg7[%c0_12, %c0_13] : memref<8x1xf32, #tpu.memory_space<vmem>>, vector<8x1xf32>
    tpu.vector_store %arg7[%c0_12, %c0_13], %44 {strides = array<i32>} : memref<8x1xf32, #tpu.memory_space<vmem>>, vector<8x1xf32>,
    %46 = vector.extract_strided_slice %24 {offsets = [0, 0], sizes = [8, 128], strides = [1, 1]} : vector<8x256xf32> to vector<8x128xf32>
    %47 = arith.truncf %46 : vector<8x128xf32> to vector<8x128xbf16>
    %c0_14 = arith.constant 0 : index
    %c0_15 = arith.constant 0 : index
    %48 = arith.index_cast %4 : i32 to index
    %49 = vector.load %arg5[%c0_14, %c0_15, %48] : memref<2x8x128xbf16, #tpu.memory_space<vmem>>, vector<1x8x128xbf16>
    %50 = vector.shape_cast %49 : vector<1x8x128xbf16> to vector<8x128xbf16>
    %51 = vector.shape_cast %47 : vector<8x128xbf16> to vector<1x8x128xbf16>
    tpu.vector_store %arg5[%c0_14, %c0_15, %48], %51 {strides = array<i32>} : memref<2x8x128xbf16, #tpu.memory_space<vmem>>, vector<1x8x128xbf16>,
    %52 = vector.extract_strided_slice %24 {offsets = [0, 128], sizes = [8, 128], strides = [1, 1]} : vector<8x256xf32> to vector<8x128xf32>
    %53 = arith.truncf %52 : vector<8x128xf32> to vector<8x128xbf16>
    %c1 = arith.constant 1 : index
    %c0_16 = arith.constant 0 : index
    %54 = arith.index_cast %4 : i32 to index
    %55 = vector.load %arg5[%c1, %c0_16, %54] : memref<2x8x128xbf16, #tpu.memory_space<vmem>>, vector<1x8x128xbf16>
    %56 = vector.shape_cast %55 : vector<1x8x128xbf16> to vector<8x128xbf16>
    %57 = vector.shape_cast %53 : vector<8x128xbf16> to vector<1x8x128xbf16>
    tpu.vector_store %arg5[%c1, %c0_16, %54], %57 {strides = array<i32>} : memref<2x8x128xbf16, #tpu.memory_space<vmem>>, vector<1x8x128xbf16>,
    %c0_i32_17 = arith.constant 0 : i32
    %58 = arith.cmpi eq, %arg1, %c0_i32_17 : i32
    %59 = arith.extui %58 : i1 to i32
    %c0_i32_18 = arith.constant 0 : i32
    %60 = arith.cmpi ne, %59, %c0_i32_18 : i32
    scf.if %60 {
      %c0_19 = arith.constant 0 : index
      %c0_20 = arith.constant 0 : index
      %61 = vector.load %arg4[%c0_19, %c0_20] : memref<8x8xf32, #tpu.memory_space<vmem>>, vector<8x1xf32>
      %c0_21 = arith.constant 0 : index
      %c1_22 = arith.constant 1 : index
      %62 = vector.load %arg4[%c0_21, %c1_22] : memref<8x8xf32, #tpu.memory_space<vmem>>, vector<8x1xf32>
      %c0_23 = arith.constant 0 : index
      %c0_24 = arith.constant 0 : index
      %63 = vector.load %arg6[%c0_23, %c0_24] : memref<8x1xf32, #tpu.memory_space<vmem>>, vector<8x1xf32>
      %cst_25 = arith.constant 3.125000e-02 : f32
      %64 = vector.broadcast %cst_25 : f32 to vector<8x1xf32>
      %65 = arith.mulf %63, %64 : vector<8x1xf32>
      %c0_26 = arith.constant 0 : index
      %c0_27 = arith.constant 0 : index
      %66 = vector.load %arg7[%c0_26, %c0_27] : memref<8x1xf32, #tpu.memory_space<vmem>>, vector<8x1xf32>
      %cst_28 = arith.constant 3.125000e-02 : f32
      %67 = vector.broadcast %cst_28 : f32 to vector<8x1xf32>
      %68 = arith.mulf %66, %67 : vector<8x1xf32>
      %69 = arith.mulf %65, %65 : vector<8x1xf32>
      %70 = arith.subf %68, %69 : vector<8x1xf32>
      %cst_29 = arith.constant 0.000000e+00 : f32
      %71 = vector.broadcast %cst_29 : f32 to vector<8x1xf32>
      %72 = arith.maximumf %70, %71 : vector<8x1xf32>
      %cst_30 = arith.constant 9.99999974E-6 : f32
      %73 = vector.broadcast %cst_30 : f32 to vector<8x1xf32>
      %74 = arith.addf %72, %73 : vector<8x1xf32>
      %75 = math.rsqrt %74 : vector<8x1xf32>
      %76 = arith.mulf %61, %75 : vector<8x1xf32>
      %77 = arith.mulf %65, %76 : vector<8x1xf32>
      %78 = arith.subf %62, %77 : vector<8x1xf32>
      %c0_31 = arith.constant 0 : index
      %c0_32 = arith.constant 0 : index
      %c0_33 = arith.constant 0 : index
      %79 = vector.load %arg5[%c0_31, %c0_32, %c0_33] : memref<2x8x128xbf16, #tpu.memory_space<vmem>>, vector<1x8x128xbf16>
      %80 = vector.shape_cast %79 : vector<1x8x128xbf16> to vector<8x128xbf16>
      %81 = arith.extf %80 : vector<8x128xbf16> to vector<8x128xf32>
      %82 = vector.broadcast %76 : vector<8x1xf32> to vector<8x128xf32>
      %83 = arith.mulf %81, %82 : vector<8x128xf32>
      %84 = vector.broadcast %78 : vector<8x1xf32> to vector<8x128xf32>
      %85 = arith.addf %83, %84 : vector<8x128xf32>
      %cst_34 = arith.constant 0.000000e+00 : f32
      %86 = vector.broadcast %cst_34 : f32 to vector<8x128xf32>
      %87 = arith.maximumf %85, %86 : vector<8x128xf32>
      %88 = arith.truncf %87 : vector<8x128xf32> to vector<8x128xbf16>
      %c0_35 = arith.constant 0 : index
      %c0_36 = arith.constant 0 : index
      %c0_37 = arith.constant 0 : index
      %89 = vector.load %arg5[%c0_35, %c0_36, %c0_37] : memref<2x8x128xbf16, #tpu.memory_space<vmem>>, vector<1x8x128xbf16>
      %90 = vector.shape_cast %89 : vector<1x8x128xbf16> to vector<8x128xbf16>
      %91 = vector.shape_cast %88 : vector<8x128xbf16> to vector<1x8x128xbf16>
      tpu.vector_store %arg5[%c0_35, %c0_36, %c0_37], %91 {strides = array<i32>} : memref<2x8x128xbf16, #tpu.memory_space<vmem>>, vector<1x8x128xbf16>,
      %c1_38 = arith.constant 1 : index
      %c0_39 = arith.constant 0 : index
      %c0_40 = arith.constant 0 : index
      %92 = vector.load %arg5[%c1_38, %c0_39, %c0_40] : memref<2x8x128xbf16, #tpu.memory_space<vmem>>, vector<1x8x128xbf16>
      %93 = vector.shape_cast %92 : vector<1x8x128xbf16> to vector<8x128xbf16>
      %94 = arith.extf %93 : vector<8x128xbf16> to vector<8x128xf32>
      %95 = vector.broadcast %76 : vector<8x1xf32> to vector<8x128xf32>
      %96 = arith.mulf %94, %95 : vector<8x128xf32>
      %97 = vector.broadcast %78 : vector<8x1xf32> to vector<8x128xf32>
      %98 = arith.addf %96, %97 : vector<8x128xf32>
      %cst_41 = arith.constant 0.000000e+00 : f32
      %99 = vector.broadcast %cst_41 : f32 to vector<8x128xf32>
      %100 = arith.maximumf %98, %99 : vector<8x128xf32>
      %101 = arith.truncf %100 : vector<8x128xf32> to vector<8x128xbf16>
      %c1_42 = arith.constant 1 : index
      %c0_43 = arith.constant 0 : index
      %c0_44 = arith.constant 0 : index
      %102 = vector.load %arg5[%c1_42, %c0_43, %c0_44] : memref<2x8x128xbf16, #tpu.memory_space<vmem>>, vector<1x8x128xbf16>
      %103 = vector.shape_cast %102 : vector<1x8x128xbf16> to vector<8x128xbf16>
      %104 = vector.shape_cast %101 : vector<8x128xbf16> to vector<1x8x128xbf16>
      tpu.vector_store %arg5[%c1_42, %c0_43, %c0_44], %104 {strides = array<i32>} : memref<2x8x128xbf16, #tpu.memory_space<vmem>>, vector<1x8x128xbf16>,
    } else {
    }
    return
  }
  func.func @transform_0(%arg0: i32, %arg1: i32) -> (i32, i32) {
    %c0_i32 = arith.constant 0 : i32
    %c0_i32_0 = arith.constant 0 : i32
    return %arg0, %c0_i32 : i32, i32
  }
  func.func @transform_1(%arg0: i32, %arg1: i32) -> (i32, i32, i32) {
    %c0_i32 = arith.constant 0 : i32
    %c0_i32_0 = arith.constant 0 : i32
    %c0_i32_1 = arith.constant 0 : i32
    %c0_i32_2 = arith.constant 0 : i32
    return %c0_i32, %c0_i32_0, %c0_i32_1 : i32, i32, i32
  }
  func.func @transform_2(%arg0: i32, %arg1: i32) -> (i32, i32) {
    %c0_i32 = arith.constant 0 : i32
    %c0_i32_0 = arith.constant 0 : i32
    return %arg0, %c0_i32 : i32, i32
  }
  func.func @transform_3(%arg0: i32, %arg1: i32) -> (i32, i32, i32) {
    %c0_i32 = arith.constant 0 : i32
    %c0_i32_0 = arith.constant 0 : i32
    %c0_i32_1 = arith.constant 0 : i32
    return %c0_i32, %arg0, %c0_i32_0 : i32, i32, i32
  }
}

</mosaic_0001>

<bundles_post_ra>
// kernel: tpu_custom_call.1
= control target key start
LH: loop header
LB: loop body
LE: loop exit
PB: predicated region body
PF: predicated region fallthrough
CT: control target
= control target key end

     0   :  { %8 = vsyncpa [#allocation5], 0  ;;  %s453_s0 = inlined_call_operand.hbm [shape: bf16[8,24], index: 0, kind: input, shape index: {}]   ;;  %s454_s1 = inlined_call_operand.hbm [shape: bf16[2,8,256], index: 1, kind: input, shape index: {}]   ;;  %s455_s2 = inlined_call_operand.hbm [shape: f32[8,8], index: 2, kind: input, shape index: {}]   ;;  %s456_s3 = inlined_call_operand.hbm [shape: bf16[2,8,128], index: 3, kind: output, shape index: {}]  }
   0x1   :  { %9 = vsyncpa [#allocation8], 0  ;;  %s26_s14 = sshll.u32 %s454_s1, 4  ;;  %s27_s14 = int_to_ptr.hbm [resolvable:$true] %s26_s14 }
   0x2   :  { %10 = vsyncpa [#allocation6], 0  ;;  %s397_s15 = smov [#allocation7]   ;;  %s16_s19 = sshll.u32 %s453_s0, 4  ;;  %s17_s19 = int_to_ptr.hbm [resolvable:$true] %s16_s19 }
   0x3   :  { %s28_s16 = sshll.u32 %s397_s15, 4  ;;  %s398_s20 = smov 128   ;;  %s29_s16 = int_to_ptr.vmem [resolvable:$true] %s28_s16 }
   0x4   :  { %s399_s21 = smov 8   ;;  %s400_s22 = smov [#allocation4]  }
   0x5   :  { %34 = dma.hbm_to_vmem [thread:$0]  %s27_s14, 256, %s29_s16, [#allocation8], %s398_s20, %s398_s20, %s399_s21  }
   0x6   :  { %s18_s23 = sshll.u32 %s400_s22, 4  ;;  %s40_s26 = sshll.u32 %s455_s2, 4  ;;  %s19_s23 = int_to_ptr.vmem [resolvable:$true] %s18_s23  ;;  %s41_s26 = int_to_ptr.hbm [resolvable:$true] %s40_s26 }
   0x7   :  { %21 = dma.hbm_to_vmem [thread:$0]  %s17_s19, 64, %s19_s23, [#allocation5]  }
   0x8   :  { %s401_s1 = smov [#allocation9]  }
   0x9   :  { %s42_s27 = sshll.u32 %s401_s1, 4  ;;  %s43_s27 = int_to_ptr.vmem [resolvable:$true] %s42_s27 }
   0xa   :  { %45 = dma.hbm_to_vmem [thread:$0]  %s41_s26, 128, %s43_s27, [#allocation8]  }
   0xb   :  { %391 = dma.done.wait [#allocation5], 64  }
   0xc   :  { %392 = vsyncadd [#allocation5], 4294967232 }
   0xd   :  { %393 = dma.done.wait [#allocation8], 384  }
   0xe   :  { %394 = vsyncadd [#allocation8], 4294966912  ;;  %v73_v0 = vld [vmem:[#allocation7 + $0x8] sm:$0xff]  ;;  %v72_v1 = vld [vmem:[#allocation7] sm:$0xff]  ;;  %s402_s0 = smov 126   ;;  %s403_s2 = smov 127   ;;  %v153_v30 = vlaneseq }
   0xf   :  { %v86_v2 = vunpack.c.l.b16 %v73_v0  ;;  %v75_v3 = vunpack.c.l.b16 %v72_v1  ;;  %v87_v6 = vunpack.c.h.b16 %v73_v0  ;;  %v76_v7 = vunpack.c.h.b16 %v72_v1  ;;  %v67_v24 = vld [vmem:[#allocation4] sm:$0xf]  ;;  %s406_s28 = smov 1   ;;  %s408_s29 = smov [#allocation10]  }
  0x10   :  { %vm63_vm0 = vcmask 7168   ;;  %v404_v10 = vmov 0.0   ;;  %vm83_vm1 = vcmask 1039360   ;;  %vm99_vm2 = vcmask 1031168   ;;  %s245_s30 = sshll.u32 %s408_s29, 4  ;;  %s247_s6 = sshll.u32 %s456_s3, 4  ;;  %s246_s30 = int_to_ptr.vmem [resolvable:$true] %s245_s30  ;;  %s248_s6 = int_to_ptr.hbm [resolvable:$true] %s247_s6 }
  0x11   :  { %v88_v4 = vpack.c.b16 %v86_v2, %v86_v2  ;;  %v77_v5 = vpack.c.b16 %v75_v3, %v75_v3  ;;  %v89_v8 = vpack.c.b16 %v87_v6, %v87_v6  ;;  %v78_v9 = vpack.c.b16 %v76_v7, %v76_v7  ;;  %64 = vst.msk [vmem:[#allocation2] sm:$0xff] %vm63_vm0, %v404_v10  ;;  %s409_s7 = smov 64   ;;  %s410_s8 = smov 4  }
  0x12   :  { %65 = vst.msk [vmem:[#allocation3] sm:$0xff] %vm63_vm0, %v404_v10  ;;  %vm108_vm3 = vcmask 1043456   ;;  %vm117_vm4 = vcmask 195584   ;;  %v154_v31 = vand.u32 127, %v153_v30  ;;  %v405_v54 = vmov 0  }
  0x13   :  { %101 = vrot.lane.b32.xlu1 %v88_v4, %s402_s0  ;;  %95 = vrot.lane.b32.xlu0 %v77_v5, %s402_s0  ;;  %v407_v6 = vmov 1  }
  0x14   :  { %79 = vrot.lane.b32.xlu2 %v77_v5, %s403_s2  ;;  %vm157_vm5 = vcmp.lt.s32.totalorder %v154_v31, 16  ;;  %290 = vset.pattern.permute.xlu1 %v405_v54 }
  0x15   :  { %v270_v32 = vsel %vm157_vm5, 1.0, %v404_v10  ;;  %292 = vset.pattern.permute.xlu0 %v407_v6 }
  0x16   :  { %v160_v33 = vperm.slane %v270_v32, 0 }
  0x18   :  { %v163_v45 = vld [vmem:[#allocation2] sm:$0xff] }
  0x19   :  { %v170_v47 = vld [vmem:[#allocation3] sm:$0xff] }
  0x1b   :  { %103 = vrot.lane.b32.xlu1 %v89_v8, %s402_s0  ;;  %97 = vrot.lane.b32.xlu0 %v78_v9, %s402_s0 }
  0x1c   :  { %81 = vrot.lane.b32.xlu2 %v78_v9, %s403_s2 }
  0x23   :  { %92 = vrot.lane.b32.xlu1 %v89_v8, %s403_s2  ;;  %90 = vrot.lane.b32.xlu0 %v88_v4, %s403_s2 }
  0x6e   :  { %v80_v11 = vpop.permute.xlu2 %79 }
  0x76   :  { %v82_v14 = vpop.permute.xlu2 %81 }
  0x77   :  { %v84_v15 = vsel %vm83_vm1, %v80_v11, %v82_v14 }
  0x78   :  { %v106_v20 = vrot.slane %v84_v15, 4 }
  0x7a   :  { %v111_v23 = vsel %vm108_vm3, %v72_v1, %v106_v20  ;;  %v190_v1 = vld [vmem:[#allocation9] sm:$0xff] }
  0x85   :  { %v102_v12 = vpop.permute.xlu1 %101  ;;  %v96_v13 = vpop.permute.xlu0 %95 }
  0x8d   :  { %v104_v16 = vpop.permute.xlu1 %103  ;;  %v98_v17 = vpop.permute.xlu0 %97 }
  0x8e   :  { %v100_v18 = vsel %vm99_vm2, %v96_v13, %v98_v17  ;;  %v105_v19 = vsel %vm99_vm2, %v102_v12, %v104_v16 }
  0x8f   :  { %v122_v21 = vsel %vm108_vm3, %v100_v18, 0  ;;  %v125_v22 = vsel %vm108_vm3, %v105_v19, 0 }
  0x90   :  { %133 = vmatpush.bf16.msra.mxu0 %v122_v21  ;;  %146 = vmatpush.bf16.msra.mxu1 %v125_v22 }
  0x94   :  { %134 = vmatpush.bf16.msra.mxu0 %v111_v23 }
  0x95   :  { %v93_v25 = vpop.permute.xlu1 %92  ;;  %v91_v26 = vpop.permute.xlu0 %90 }
  0x96   :  { %v94_v27 = vsel %vm83_vm1, %v91_v26, %v93_v25 }
  0x97   :  { %v107_v28 = vrot.slane %v94_v27, 4  ;;  %268 = vmatmul.msk.bf16.vlgmr.msra.gmra.mxu0 %vm117_vm4, %v67_v24 }
  0x99   :  { %v115_v29 = vsel %vm108_vm3, %v73_v0, %v107_v28 }
  0x9a   :  { %147 = vmatpush.bf16.msra.mxu1 %v115_v29 }
  0x9d   :  { %269 = vmatmul.msk.bf16.vlgmr.msra.gmra.mxu1 %vm117_vm4, %v67_v24 }
 0x114   :  { %v136_v34 = vpop.f32.mrf.mxu0 }
 0x115   :  { %v161_v35 = vmul.f32 %v160_v33, %v136_v34 }
 0x117   :  { %v171_v39 = vmul.f32 %v161_v35, %v161_v35 }
 0x11a   :  { %v149_v36 = vpop.f32.mrf.mxu1 }
 0x11b   :  { %v162_v37 = vmul.f32 %v160_v33, %v149_v36  ;;  %v274_v38 = vpack.c.bf16 %v149_v36, %v136_v34 }
 0x11c   :  { %v138_v40 = vpop.f32.mrf.mxu0 }
 0x11d   :  { %275 = vst [vmem:[#allocation10] sm:$0xff] %v274_v38   ;;  %v164_v41 = vadd.f32 %v162_v37, %v161_v35  ;;  %v172_v42 = vmul.f32 %v162_v37, %v162_v37 }
 0x11f   :  { %165 = vadd.xlane.f32.xlu2 %v164_v41  ;;  %v173_v43 = vadd.f32 %v172_v42, %v171_v39 }
 0x121   :  { %174 = vadd.xlane.f32.xlu0 %v173_v43 }
 0x122   :  { %v151_v44 = vpop.f32.mrf.mxu1 }
 0x124   :  { %v216_v10 = vld [vmem:[#allocation10] sm:$0xff]  }
 0x125   :  { %v217_v11 = vunpack.c.l.bf16 %v216_v10  ;;  %v235_v12 = vunpack.c.h.bf16 %v216_v10 }
 0x192   :  { %v166_v46 = vpop.xlane.xlu2 %165 }
 0x193   :  { %v167_v48 = vadd.f32 %v166_v46, %v163_v45 }
 0x194   :  { %v175_v49 = vpop.xlane.xlu0 %174 }
 0x195   :  { %169 = vst.msk [vmem:[#allocation2] sm:$0xff] %vm63_vm0, %v167_v48  ;;  %v176_v50 = vadd.f32 %v175_v49, %v170_v47 }
 0x197   :  { %177 = vst.msk [vmem:[#allocation3] sm:$0xff] %vm63_vm0, %v176_v50 }
 0x19c   :  { %v191_v51 = vld [vmem:[#allocation2] sm:$0xff] }
 0x19d   :  { %v192_v52 = vmul.f32 0.03125, %v191_v51 }
 0x19e   :  { %v193_v53 = vld [vmem:[#allocation3] sm:$0xff] }
 0x19f   :  { %v194_v55 = vmul.f32 0.03125, %v193_v53  ;;  %v195_v56 = vmul.f32 %v192_v52, %v192_v52 }
 0x1a1   :  { %v196_v57 = vsub.f32 %v194_v55, %v195_v56 }
 0x1a3   :  { %v197_v58 = vmax.f32 %v196_v57, 0.0 }
 0x1a5   :  { %v198_v59 = vadd.f32 1e-05, %v197_v58 }
 0x1a7   :  { %293 = vrsqrt.f32 %v198_v59  ;;  %vm205_vm7 = vweird.f32 %v198_v59 }
 0x1ad   :  { %v294_v60 = vpop.eup %293 }
 0x1ae   :  { %v200_v61 = vmul.f32 %v294_v60, %v198_v59  ;;  %vm206_vm6 = vweird.f32 %v294_v60 }
 0x1af   :  { %vm207_vm8 = vmor %vm205_vm7, %vm206_vm6 }
 0x1b0   :  { %v201_v62 = vmul.f32 %v294_v60, %v200_v61 }
 0x1b2   :  { %v202_v63 = vmul.f32 0.5, %v201_v62 }
 0x1b4   :  { %v203_v0 = vsub.f32 1.5, %v202_v63 }
 0x1b6   :  { %v204_v2 = vmul.f32 %v294_v60, %v203_v0 }
 0x1b8   :  { %v208_v3 = vsel %vm207_vm8, %v294_v60, %v204_v2 }
 0x1b9   :  { %v209_v4 = vmul.f32 %v208_v3, %v190_v1 }
 0x1bb   :  { %v210_v5 = vmul.f32 %v209_v4, %v192_v52 }
 0x1bd   :  { %212 = vrot.lane.b32.xlu1 %v210_v5, %s406_s28 }
 0x1c5   :  { %220 = vperm.xlu1 %290, %v209_v4  }
 0x1cd   :  { %291 = vset.pattern.permute.xlu1 %v407_v6 }
 0x22f   :  { %v213_v7 = vpop.permute.xlu1 %212 }
 0x230   :  { %v215_v8 = vsub.f32 %v190_v1, %v213_v7 }
 0x232   :  { %226 = vperm.xlu1 %291, %v215_v8  }
 0x237   :  { %v221_v9 = vpop.permute.xlu1 %220 }
 0x238   :  { %v223_v13 = vmul.f32 %v221_v9, %v217_v11  ;;  %v236_v14 = vmul.f32 %v235_v12, %v221_v9 }
 0x2a4   :  { %v227_v15 = vpop.permute.xlu1 %226 }
 0x2a5   :  { %v229_v16 = vadd.f32 %v227_v15, %v223_v13  ;;  %v237_v17 = vadd.f32 %v236_v14, %v227_v15 }
 0x2a7   :  { %v230_v18 = vmax.f32 %v229_v16, 0.0  ;;  %v238_v19 = vmax.f32 %v237_v17, 0.0 }
 0x2a9   :  { %v231_v20 = vpack.c.bf16 %v230_v18, %v230_v18  ;;  %v239_v21 = vpack.c.bf16 %v238_v19, %v238_v19 }
 0x2ab   :  { %232 = vst [vmem:[#allocation10] sm:$0xf] %v231_v20 }
 0x2ac   :  { %240 = vst [vmem:[#allocation10 + $0x4] sm:$0xf] %v239_v21 }
 0x2ad   :  { %253 = dma.vmem_to_hbm [thread:$0]  %s246_s30, 128, %s248_s6, [#allocation6], %s409_s7, %s409_s7, %s410_s8  }
 0x2ae   :  { %395 = dma.done.wait [#allocation6], 128  }
 0x2af   :  { %396 = vsyncadd [#allocation6], 4294967168 }
 0x2b0   :  { %258 = vsyncpa [#allocation5], 1 }
 0x2b1   :  { %259 = vsyncpa [#allocation8], 1 }
 0x2b2   :  { %260 = vsyncpa [#allocation6], 1 }

</bundles_post_ra>
